<compile_context>
chip_gen: v7x
topology: tpu7x:2x2x1
jax: 0.10.0
libtpu: 0.0.40
codegen_flags: <defaults>
</compile_context>

<pallas_src>
import jax
import jax.numpy as jnp
from jax.experimental import pallas as pl
from jax.experimental.pallas import tpu as pltpu

NEG_SLOPE = 0.01          # torch.nn.LeakyReLU default
H1, H2 = 256, 512
OUT_DIM = 288             # true model output width
OUT_PAD = 384             # padded to a multiple of 128 for lane-dense stores
MAX_TB = 1024             # batch tile cap (fits default scoped VMEM everywhere)


def _lrelu(x):
    return jnp.where(x > 0, x, NEG_SLOPE * x)


def forward_model_kernel(f_ref, a_ref, w1f_ref, w1a_ref, b1_ref,
                         w2_ref, b2_ref, w3_ref, b3_ref, out_ref):
    """One batch tile of the full 3-layer MLP.

    f_ref   : (TB, feat_dim) f32      a_ref  : (TB, act_dim) f32
    w1f_ref : (feat_dim, 256) bf16    w1a_ref: (act_dim, 256) bf16
    w2_ref  : (256, 512) bf16         w3_ref : (512, 384) bf16 (cols 288.. = 0)
    b*_ref  : (1, N) f32              out_ref: (TB, 384) f32
    """
    # bf16 MXU inputs, f32 accumulation; elementwise work kept in f32 (fast on
    # v5e which has no bf16 VPU/EUP path, fine everywhere else).
    f16 = f_ref[...].astype(jnp.bfloat16)
    a16 = a_ref[...].astype(jnp.bfloat16)

    h1 = (jnp.dot(f16, w1f_ref[...], preferred_element_type=jnp.float32)
          + jnp.dot(a16, w1a_ref[...], preferred_element_type=jnp.float32)
          + b1_ref[...])
    h1 = _lrelu(h1)

    h2 = jnp.dot(h1.astype(jnp.bfloat16), w2_ref[...],
                 preferred_element_type=jnp.float32) + b2_ref[...]
    h2 = _lrelu(h2)

    out = jnp.dot(h2.astype(jnp.bfloat16), w3_ref[...],
                  preferred_element_type=jnp.float32) + b3_ref[...]
    out_ref[...] = out.astype(out_ref.dtype)


@jax.jit
def forward_model(features, action_indices, params):
    """features (B, feat_dim) f32, action_indices (B, act_dim) f32 -> (B, 288)."""
    B, feat_dim = features.shape
    act_dim = action_indices.shape[1]
    w1f, w1a, b1 = params["w1f"], params["w1a"], params["b1"]
    w2, b2 = params["w2"], params["b2"]
    w3, b3 = params["w3"], params["b3"]

    # Batch tile: whole batch if small, otherwise 1024-row tiles (grid loops /
    # megacore-shards over them). Weights are re-used (same block index) so
    # they are DMA'd once and stay VMEM-resident across grid steps.
    tb = B if B <= MAX_TB else MAX_TB
    grid = (pl.cdiv(B, tb),)

    flops = 2 * B * ((feat_dim + act_dim) * H1 + H1 * H2 + H2 * OUT_PAD)
    bytes_accessed = (features.size * 4 + action_indices.size * 4
                      + (w1f.size + w1a.size + w2.size + w3.size) * 2
                      + (b1.size + b2.size + b3.size) * 4
                      + B * OUT_PAD * 4)

    out = pl.pallas_call(
        forward_model_kernel,
        out_shape=jax.ShapeDtypeStruct((B, OUT_PAD), jnp.float32),
        grid_spec=pltpu.PrefetchScalarGridSpec(
            num_scalar_prefetch=0,
            grid=grid,
            in_specs=[
                pl.BlockSpec((tb, feat_dim), lambda i: (i, 0)),   # features
                pl.BlockSpec((tb, act_dim), lambda i: (i, 0)),    # actions
                pl.BlockSpec((feat_dim, H1), lambda i: (0, 0)),   # w1f
                pl.BlockSpec((act_dim, H1), lambda i: (0, 0)),    # w1a
                pl.BlockSpec((1, H1), lambda i: (0, 0)),          # b1
                pl.BlockSpec((H1, H2), lambda i: (0, 0)),         # w2
                pl.BlockSpec((1, H2), lambda i: (0, 0)),          # b2
                pl.BlockSpec((H2, OUT_PAD), lambda i: (0, 0)),    # w3 (padded)
                pl.BlockSpec((1, OUT_PAD), lambda i: (0, 0)),     # b3 (padded)
            ],
            out_specs=pl.BlockSpec((tb, OUT_PAD), lambda i: (i, 0)),
        ),
        compiler_params=pltpu.CompilerParams(
            dimension_semantics=("parallel",),        # megacore split on v7x
            vmem_limit_bytes=64 * 1024 * 1024,        # safe on v5e/v6e/v7x
        ),
        cost_estimate=pl.CostEstimate(
            flops=flops, transcendentals=0, bytes_accessed=bytes_accessed),
    )(features, action_indices, w1f, w1a, b1, w2, b2, w3, b3)

    # Drop the lane-padding columns (288..383 are exact zeros of W3/b3 pad).
    return out[:, :OUT_DIM]


def init_params(key, feat_dim, act_dim):
    """Mirror the PyTorch module's init.

    Weights: xavier_uniform_; biases: PyTorch Linear default
    U(-1/sqrt(fan_in), +1/sqrt(fan_in)). Weights pre-transposed to (in, out),
    W1 split into feature/action halves, W3/b3 zero-padded 288 -> 384,
    weights stored in bf16 (f32 biases).
    """
    f_layer_size = feat_dim + act_dim
    params = {}

    def linear(key, fan_in, fan_out):
        kw, kb = jax.random.split(key)
        bound_w = (6.0 / (fan_in + fan_out)) ** 0.5           # xavier_uniform
        w = jax.random.uniform(kw, (fan_in, fan_out), jnp.float32,
                               -bound_w, bound_w)
        bound_b = 1.0 / (fan_in ** 0.5)                       # torch bias default
        b = jax.random.uniform(kb, (1, fan_out), jnp.float32,
                               -bound_b, bound_b)
        return w, b

    key, k1, k2, k3 = jax.random.split(key, 4)
    w1, b1 = linear(k1, f_layer_size, H1)
    w2, b2 = linear(k2, H1, H2)
    w3, b3 = linear(k3, H2, OUT_DIM)

    # Split first layer by input block (concat is folded into the kernel).
    params["w1f"] = w1[:feat_dim].astype(jnp.bfloat16)
    params["w1a"] = w1[feat_dim:].astype(jnp.bfloat16)
    params["b1"] = b1
    params["w2"] = w2.astype(jnp.bfloat16)
    params["b2"] = b2
    # Zero-pad last layer to 384 output features for lane-dense stores.
    w3_pad = jnp.zeros((H2, OUT_PAD), jnp.float32).at[:, :OUT_DIM].set(w3)
    b3_pad = jnp.zeros((1, OUT_PAD), jnp.float32).at[:, :OUT_DIM].set(b3)
    params["w3"] = w3_pad.astype(jnp.bfloat16)
    params["b3"] = b3_pad
    return params


def reference_forward(features, action_indices, params):
    """Pure-JAX reference with the same bf16-input / f32-accumulate math."""
    f16 = features.astype(jnp.bfloat16)
    a16 = action_indices.astype(jnp.bfloat16)
    h1 = _lrelu(jnp.dot(f16, params["w1f"], preferred_element_type=jnp.float32)
                + jnp.dot(a16, params["w1a"], preferred_element_type=jnp.float32)
                + params["b1"])
    h2 = _lrelu(jnp.dot(h1.astype(jnp.bfloat16), params["w2"],
                        preferred_element_type=jnp.float32) + params["b2"])
    out = jnp.dot(h2.astype(jnp.bfloat16), params["w3"],
                  preferred_element_type=jnp.float32) + params["b3"]
    return out[:, :OUT_DIM]


if __name__ == "__main__":
    key = jax.random.PRNGKey(0)
    kf, ka, kp = jax.random.split(key, 3)

    B = 8
    feat_dim = 24
    act_dim = 8            # f_layer_size = 32

    features = jax.random.normal(kf, (B, feat_dim), jnp.float32)
    action_indices = jax.random.normal(ka, (B, act_dim), jnp.float32)
    params = init_params(kp, feat_dim, act_dim)

    out = forward_model(features, action_indices, params)
    out = jax.block_until_ready(out)

    ref = reference_forward(features, action_indices, params)
    assert out.shape == (B, OUT_DIM), out.shape
    assert jnp.allclose(out, ref, atol=5e-3, rtol=5e-3), "mismatch vs reference"

    print("KERNEL_OK")
</pallas_src>

<mosaic_0001>
module attributes {stable_mosaic.version = 11 : i64} {
  func.func @forward_model_kernel(%arg0: i32, %arg1: memref<8x24xf32, #tpu.memory_space<vmem>>, %arg2: memref<8x8xf32, #tpu.memory_space<vmem>>, %arg3: memref<24x256xbf16, #tpu.memory_space<vmem>>, %arg4: memref<8x256xbf16, #tpu.memory_space<vmem>>, %arg5: memref<1x256xf32, #tpu.memory_space<vmem>>, %arg6: memref<256x512xbf16, #tpu.memory_space<vmem>>, %arg7: memref<1x512xf32, #tpu.memory_space<vmem>>, %arg8: memref<512x384xbf16, #tpu.memory_space<vmem>>, %arg9: memref<1x384xf32, #tpu.memory_space<vmem>>, %arg10: memref<8x384xf32, #tpu.memory_space<vmem>>) attributes {dimension_semantics = [#tpu.dimension_semantics<parallel>], iteration_bounds = array<i64: 1>, scalar_prefetch = 0 : i64, scratch_operands = 0 : i64, tpu.core_type = #tpu.core_type<tc>, window_params = [{transform_indices = @transform_0, window_bounds = array<i64: 8, 24>}, {transform_indices = @transform_1, window_bounds = array<i64: 8, 8>}, {pipeline_mode = #tpu.pipeline_mode<synchronous>, transform_indices = @transform_2, window_bounds = array<i64: 24, 256>}, {pipeline_mode = #tpu.pipeline_mode<synchronous>, transform_indices = @transform_3, window_bounds = array<i64: 8, 256>}, {pipeline_mode = #tpu.pipeline_mode<synchronous>, transform_indices = @transform_4, window_bounds = array<i64: 1, 256>}, {pipeline_mode = #tpu.pipeline_mode<synchronous>, transform_indices = @transform_5, window_bounds = array<i64: 256, 512>}, {pipeline_mode = #tpu.pipeline_mode<synchronous>, transform_indices = @transform_6, window_bounds = array<i64: 1, 512>}, {pipeline_mode = #tpu.pipeline_mode<synchronous>, transform_indices = @transform_7, window_bounds = array<i64: 512, 384>}, {pipeline_mode = #tpu.pipeline_mode<synchronous>, transform_indices = @transform_8, window_bounds = array<i64: 1, 384>}, {transform_indices = @transform_9, window_bounds = array<i64: 8, 384>}]} {
    %c0 = arith.constant 0 : index
    %c0_0 = arith.constant 0 : index
    %0 = vector.load %arg1[%c0, %c0_0] : memref<8x24xf32, #tpu.memory_space<vmem>>, vector<8x24xf32>
    %1 = arith.truncf %0 : vector<8x24xf32> to vector<8x24xbf16>
    %c0_1 = arith.constant 0 : index
    %c0_2 = arith.constant 0 : index
    %2 = vector.load %arg2[%c0_1, %c0_2] : memref<8x8xf32, #tpu.memory_space<vmem>>, vector<8x8xf32>
    %3 = arith.truncf %2 : vector<8x8xf32> to vector<8x8xbf16>
    %c0_3 = arith.constant 0 : index
    %c0_4 = arith.constant 0 : index
    %4 = vector.load %arg3[%c0_3, %c0_4] : memref<24x256xbf16, #tpu.memory_space<vmem>>, vector<24x256xbf16>
    %cst = arith.constant dense<0.000000e+00> : vector<8x256xf32>
    %5 = tpu.matmul %1, %4, %cst {dimension_numbers = #tpu.dot_dimension_numbers<[1], [0], [0], [1], [0, 0, 1, 1], [], []>} : vector<8x24xbf16>, vector<24x256xbf16>, vector<8x256xf32> -> vector<8x256xf32>
    %c0_5 = arith.constant 0 : index
    %c0_6 = arith.constant 0 : index
    %6 = vector.load %arg4[%c0_5, %c0_6] : memref<8x256xbf16, #tpu.memory_space<vmem>>, vector<8x256xbf16>
    %cst_7 = arith.constant dense<0.000000e+00> : vector<8x256xf32>
    %7 = tpu.matmul %3, %6, %cst_7 {dimension_numbers = #tpu.dot_dimension_numbers<[1], [0], [0], [1], [0, 0, 1, 1], [], []>} : vector<8x8xbf16>, vector<8x256xbf16>, vector<8x256xf32> -> vector<8x256xf32>
    %8 = arith.addf %5, %7 : vector<8x256xf32>
    %c0_8 = arith.constant 0 : index
    %c0_9 = arith.constant 0 : index
    %9 = vector.load %arg5[%c0_8, %c0_9] : memref<1x256xf32, #tpu.memory_space<vmem>>, vector<1x256xf32>
    %10 = vector.broadcast %9 : vector<1x256xf32> to vector<8x256xf32>
    %11 = arith.addf %8, %10 : vector<8x256xf32>
    %cst_10 = arith.constant 0.000000e+00 : f32
    %12 = vector.broadcast %cst_10 : f32 to vector<8x256xf32>
    %13 = arith.cmpf ogt, %11, %12 : vector<8x256xf32>
    %cst_11 = arith.constant 0.00999999977 : f32
    %14 = vector.broadcast %cst_11 : f32 to vector<8x256xf32>
    %15 = arith.mulf %14, %11 : vector<8x256xf32>
    %16 = arith.select %13, %11, %15 : vector<8x256xi1>, vector<8x256xf32>
    %17 = arith.truncf %16 : vector<8x256xf32> to vector<8x256xbf16>
    %c0_12 = arith.constant 0 : index
    %c0_13 = arith.constant 0 : index
    %18 = vector.load %arg6[%c0_12, %c0_13] : memref<256x512xbf16, #tpu.memory_space<vmem>>, vector<256x512xbf16>
    %cst_14 = arith.constant dense<0.000000e+00> : vector<8x512xf32>
    %19 = tpu.matmul %17, %18, %cst_14 {dimension_numbers = #tpu.dot_dimension_numbers<[1], [0], [0], [1], [0, 0, 1, 1], [], []>} : vector<8x256xbf16>, vector<256x512xbf16>, vector<8x512xf32> -> vector<8x512xf32>
    %c0_15 = arith.constant 0 : index
    %c0_16 = arith.constant 0 : index
    %20 = vector.load %arg7[%c0_15, %c0_16] : memref<1x512xf32, #tpu.memory_space<vmem>>, vector<1x512xf32>
    %21 = vector.broadcast %20 : vector<1x512xf32> to vector<8x512xf32>
    %22 = arith.addf %19, %21 : vector<8x512xf32>
    %cst_17 = arith.constant 0.000000e+00 : f32
    %23 = vector.broadcast %cst_17 : f32 to vector<8x512xf32>
    %24 = arith.cmpf ogt, %22, %23 : vector<8x512xf32>
    %cst_18 = arith.constant 0.00999999977 : f32
    %25 = vector.broadcast %cst_18 : f32 to vector<8x512xf32>
    %26 = arith.mulf %25, %22 : vector<8x512xf32>
    %27 = arith.select %24, %22, %26 : vector<8x512xi1>, vector<8x512xf32>
    %28 = arith.truncf %27 : vector<8x512xf32> to vector<8x512xbf16>
    %c0_19 = arith.constant 0 : index
    %c0_20 = arith.constant 0 : index
    %29 = vector.load %arg8[%c0_19, %c0_20] : memref<512x384xbf16, #tpu.memory_space<vmem>>, vector<512x384xbf16>
    %cst_21 = arith.constant dense<0.000000e+00> : vector<8x384xf32>
    %30 = tpu.matmul %28, %29, %cst_21 {dimension_numbers = #tpu.dot_dimension_numbers<[1], [0], [0], [1], [0, 0, 1, 1], [], []>} : vector<8x512xbf16>, vector<512x384xbf16>, vector<8x384xf32> -> vector<8x384xf32>
    %c0_22 = arith.constant 0 : index
    %c0_23 = arith.constant 0 : index
    %31 = vector.load %arg9[%c0_22, %c0_23] : memref<1x384xf32, #tpu.memory_space<vmem>>, vector<1x384xf32>
    %32 = vector.broadcast %31 : vector<1x384xf32> to vector<8x384xf32>
    %33 = arith.addf %30, %32 : vector<8x384xf32>
    %c0_24 = arith.constant 0 : index
    %c0_25 = arith.constant 0 : index
    %34 = vector.load %arg10[%c0_24, %c0_25] : memref<8x384xf32, #tpu.memory_space<vmem>>, vector<8x384xf32>
    tpu.vector_store %arg10[%c0_24, %c0_25], %33 {strides = array<i32>} : memref<8x384xf32, #tpu.memory_space<vmem>>, vector<8x384xf32>,
    return
  }
  func.func @transform_0(%arg0: i32) -> (i32, i32) {
    %c0_i32 = arith.constant 0 : i32
    %c0_i32_0 = arith.constant 0 : i32
    return %arg0, %c0_i32 : i32, i32
  }
  func.func @transform_1(%arg0: i32) -> (i32, i32) {
    %c0_i32 = arith.constant 0 : i32
    %c0_i32_0 = arith.constant 0 : i32
    return %arg0, %c0_i32 : i32, i32
  }
  func.func @transform_2(%arg0: i32) -> (i32, i32) {
    %c0_i32 = arith.constant 0 : i32
    %c0_i32_0 = arith.constant 0 : i32
    %c0_i32_1 = arith.constant 0 : i32
    return %c0_i32, %c0_i32_0 : i32, i32
  }
  func.func @transform_3(%arg0: i32) -> (i32, i32) {
    %c0_i32 = arith.constant 0 : i32
    %c0_i32_0 = arith.constant 0 : i32
    %c0_i32_1 = arith.constant 0 : i32
    return %c0_i32, %c0_i32_0 : i32, i32
  }
  func.func @transform_4(%arg0: i32) -> (i32, i32) {
    %c0_i32 = arith.constant 0 : i32
    %c0_i32_0 = arith.constant 0 : i32
    %c0_i32_1 = arith.constant 0 : i32
    return %c0_i32, %c0_i32_0 : i32, i32
  }
  func.func @transform_5(%arg0: i32) -> (i32, i32) {
    %c0_i32 = arith.constant 0 : i32
    %c0_i32_0 = arith.constant 0 : i32
    %c0_i32_1 = arith.constant 0 : i32
    return %c0_i32, %c0_i32_0 : i32, i32
  }
  func.func @transform_6(%arg0: i32) -> (i32, i32) {
    %c0_i32 = arith.constant 0 : i32
    %c0_i32_0 = arith.constant 0 : i32
    %c0_i32_1 = arith.constant 0 : i32
    return %c0_i32, %c0_i32_0 : i32, i32
  }
  func.func @transform_7(%arg0: i32) -> (i32, i32) {
    %c0_i32 = arith.constant 0 : i32
    %c0_i32_0 = arith.constant 0 : i32
    %c0_i32_1 = arith.constant 0 : i32
    return %c0_i32, %c0_i32_0 : i32, i32
  }
  func.func @transform_8(%arg0: i32) -> (i32, i32) {
    %c0_i32 = arith.constant 0 : i32
    %c0_i32_0 = arith.constant 0 : i32
    %c0_i32_1 = arith.constant 0 : i32
    return %c0_i32, %c0_i32_0 : i32, i32
  }
  func.func @transform_9(%arg0: i32) -> (i32, i32) {
    %c0_i32 = arith.constant 0 : i32
    %c0_i32_0 = arith.constant 0 : i32
    return %arg0, %c0_i32 : i32, i32
  }
}

</mosaic_0001>

<bundles_post_ra>
// kernel: forward_model.1
= control target key start
LH: loop header
LB: loop body
LE: loop exit
PB: predicated region body
PF: predicated region fallthrough
CT: control target
= control target key end

     0   :  { %14 = vsyncpa [#allocation3], 0  ;;  %s2569_s0 = inlined_call_operand.hbm [shape: f32[8,24], index: 0, kind: input, shape index: {}]   ;;  %s2570_s1 = inlined_call_operand.hbm [shape: f32[8,8], index: 1, kind: input, shape index: {}]   ;;  %s2571_s2 = inlined_call_operand.hbm [shape: bf16[24,256], index: 2, kind: input, shape index: {}]   ;;  %s2572_s3 = inlined_call_operand.hbm [shape: bf16[8,256], index: 3, kind: input, shape index: {}]   ;;  %s2573_s4 = inlined_call_operand.hbm [shape: f32[1,256], index: 4, kind: input, shape index: {}]   ;;  %s2574_s5 = inlined_call_operand.hbm [shape: bf16[256,512], index: 5, kind: input, shape index: {}]   ;;  %s2575_s6 = inlined_call_operand.hbm [shape: f32[1,512], index: 6, kind: input, shape index: {}]   ;;  %s2576_s7 = inlined_call_operand.hbm [shape: bf16[512,384], index: 7, kind: input, shape index: {}]   ;;  %s2577_s8 = inlined_call_operand.hbm [shape: f32[1,384], index: 8, kind: input, shape index: {}]   ;;  %s2578_s9 = inlined_call_operand.hbm [shape: f32[8,384], index: 9, kind: output, shape index: {}]  }
   0x1   :  { %15 = vsyncpa [#allocation6], 0 }
   0x2   :  { %16 = vsyncpa [#allocation9], 0 }
   0x3   :  { %17 = vsyncpa [#allocation12], 0 }
   0x4   :  { %18 = vsyncpa [#allocation15], 0 }
   0x5   :  { %19 = vsyncpa [#allocation4], 0  ;;  %s2342_s30 = smov [#allocation5]   ;;  %s2343_s11 = smov [#allocation8]  }
   0x6   :  { %s36_s10 = sshll.u32 %s2342_s30, 4  ;;  %s58_s12 = sshll.u32 %s2343_s11, 4  ;;  %s37_s10 = int_to_ptr.vmem [resolvable:$true] %s36_s10  ;;  %s59_s12 = int_to_ptr.vmem [resolvable:$true] %s58_s12 }
   0x7   :  { %s2110_s15 = scalar_lea.hbm %s2570_s1, 128 }
   0x8   :  { %p2111_p0 = scmp.ne.s32.totalorder %s2570_s1, %s2110_s15  ;;  %p2114_p1 = scmp.lt.u32.totalorder %s2110_s15, %s2570_s1 }
   0xa   :  { %p2116_p2 = pnand %p2114_p1, %p2111_p0 }
   0xc   :  { %2119 = shalt.err (!%p2116_p2)
}
   0xd   :  { %s2120_s20 = scalar_lea.vmem %s37_s10, 128  ;;  %p2125_p4 = scmp.lt.s32.totalorder %s37_s10, %s37_s10 }
   0xe   :  { %p2121_p3 = scmp.ne.s32.totalorder %s37_s10, %s2120_s20  ;;  %p2126_p5 = scmp.lt.s32.totalorder %s2120_s20, %s2120_s20 }
  0x10   :  { %p2127_p6 = por %p2126_p5, %p2125_p4 }
  0x12   :  { %p2128_p7 = pnand %p2127_p6, %p2121_p3 }
  0x14   :  { %2131 = shalt.err (!%p2128_p7)
}
  0x15   :  { %39 = dma.hbm_to_vmem [thread:$0]  %s2570_s1, 128, %s37_s10, [#allocation6]  }
  0x16   :  { %s2132_s25 = scalar_lea.hbm %s2572_s3, 128 }
  0x17   :  { %p2133_p8 = scmp.ne.s32.totalorder %s2572_s3, %s2132_s25  ;;  %p2136_p9 = scmp.lt.u32.totalorder %s2132_s25, %s2572_s3 }
  0x19   :  { %p2138_p10 = pnand %p2136_p9, %p2133_p8 }
  0x1b   :  { %2141 = shalt.err (!%p2138_p10)
}
  0x1c   :  { %s2142_s30 = scalar_lea.vmem %s59_s12, 128  ;;  %p2147_p12 = scmp.lt.s32.totalorder %s59_s12, %s59_s12 }
  0x1d   :  { %p2143_p11 = scmp.ne.s32.totalorder %s59_s12, %s2142_s30  ;;  %p2148_p13 = scmp.lt.s32.totalorder %s2142_s30, %s2142_s30 }
  0x1f   :  { %p2149_p0 = por %p2148_p13, %p2147_p12 }
  0x21   :  { %p2150_p1 = pnand %p2149_p0, %p2143_p11 }
  0x23   :  { %2153 = shalt.err (!%p2150_p1)
}
  0x24   :  { %61 = dma.hbm_to_vmem [thread:$0]  %s2572_s3, 128, %s59_s12, [#allocation9]  }
  0x25   :  { %s2344_s11 = smov [#allocation11]   ;;  %s2154_s16 = scalar_lea.hbm %s2574_s5, 8192 }
  0x26   :  { %s77_s13 = sshll.u32 %s2344_s11, 4  ;;  %p2155_p2 = scmp.ne.s32.totalorder %s2574_s5, %s2154_s16  ;;  %s78_s13 = int_to_ptr.vmem [resolvable:$true] %s77_s13 }
  0x27   :  { %p2158_p3 = scmp.lt.u32.totalorder %s2154_s16, %s2574_s5 }
  0x29   :  { %p2160_p4 = pnand %p2158_p3, %p2155_p2 }
  0x2b   :  { %2163 = shalt.err (!%p2160_p4)
}
  0x2c   :  { %s2164_s21 = scalar_lea.vmem %s78_s13, 8192  ;;  %p2169_p6 = scmp.lt.s32.totalorder %s78_s13, %s78_s13 }
  0x2d   :  { %p2165_p5 = scmp.ne.s32.totalorder %s78_s13, %s2164_s21  ;;  %p2170_p7 = scmp.lt.s32.totalorder %s2164_s21, %s2164_s21 }
  0x2f   :  { %p2171_p8 = por %p2170_p7, %p2169_p6 }
  0x31   :  { %p2172_p9 = pnand %p2171_p8, %p2165_p5 }
  0x33   :  { %2175 = shalt.err (!%p2172_p9)
}
  0x34   :  { %s2345_s3 = smov 256   ;;  %s2346_s12 = smov 16  }
  0x35   :  { %83 = dma.hbm_to_vmem [thread:$0]  %s2574_s5, 8192, %s78_s13, [#allocation12], %s2345_s3, %s2345_s3, %s2346_s12  }
  0x36   :  { %s2347_s24 = smov [#allocation14]   ;;  %s2176_s28 = scalar_lea.hbm %s2576_s7, 12288 }
  0x37   :  { %s99_s25 = sshll.u32 %s2347_s24, 4  ;;  %p2177_p10 = scmp.ne.s32.totalorder %s2576_s7, %s2176_s28  ;;  %s100_s25 = int_to_ptr.vmem [resolvable:$true] %s99_s25 }
  0x38   :  { %p2180_p11 = scmp.lt.u32.totalorder %s2176_s28, %s2576_s7 }
  0x3a   :  { %p2182_p12 = pnand %p2180_p11, %p2177_p10 }
  0x3c   :  { %2185 = shalt.err (!%p2182_p12)
}
  0x3d   :  { %s2186_s11 = scalar_lea.vmem %s100_s25, 12288  ;;  %p2191_p0 = scmp.lt.s32.totalorder %s100_s25, %s100_s25 }
  0x3e   :  { %p2187_p13 = scmp.ne.s32.totalorder %s100_s25, %s2186_s11  ;;  %p2192_p1 = scmp.lt.s32.totalorder %s2186_s11, %s2186_s11 }
  0x40   :  { %p2193_p2 = por %p2192_p1, %p2191_p0 }
  0x42   :  { %p2194_p3 = pnand %p2193_p2, %p2187_p13 }
  0x44   :  { %2197 = shalt.err (!%p2194_p3)
}
  0x45   :  { %s2348_s5 = smov 192   ;;  %s2349_s13 = smov 12  }
  0x46   :  { %105 = dma.hbm_to_vmem [thread:$0]  %s2576_s7, 12288, %s100_s25, [#allocation15], %s2348_s5, %s2348_s5, %s2349_s13  }
  0x47   :  { %s2350_s16 = smov [#allocation2]   ;;  %s2351_s18 = smov [#allocation7]  }
  0x48   :  { %s26_s17 = sshll.u32 %s2350_s16, 4  ;;  %s45_s19 = sshll.u32 %s2351_s18, 4  ;;  %s27_s17 = int_to_ptr.vmem [resolvable:$true] %s26_s17  ;;  %s2457_s19 = int_to_ptr.vmem [resolvable:$true] %s45_s19 }
  0x49   :  { %s2198_s3 = scalar_lea.hbm %s2569_s0, 128 }
  0x4a   :  { %p2199_p4 = scmp.ne.s32.totalorder %s2569_s0, %s2198_s3  ;;  %p2202_p5 = scmp.lt.u32.totalorder %s2198_s3, %s2569_s0 }
  0x4c   :  { %p2204_p6 = pnand %p2202_p5, %p2199_p4 }
  0x4e   :  { %2207 = shalt.err (!%p2204_p6)
}
  0x4f   :  { %s2208_s7 = scalar_lea.vmem %s27_s17, 128  ;;  %p2213_p8 = scmp.lt.s32.totalorder %s27_s17, %s27_s17 }
  0x50   :  { %p2209_p7 = scmp.ne.s32.totalorder %s27_s17, %s2208_s7  ;;  %p2214_p9 = scmp.lt.s32.totalorder %s2208_s7, %s2208_s7 }
  0x52   :  { %p2215_p10 = por %p2214_p9, %p2213_p8 }
  0x54   :  { %p2216_p11 = pnand %p2215_p10, %p2209_p7 }
  0x56   :  { %2219 = shalt.err (!%p2216_p11)
}
  0x57   :  { %29 = dma.hbm_to_vmem [thread:$0]  %s2569_s0, 128, %s27_s17, [#allocation3]  }
  0x58   :  { %s2220_s29 = scalar_lea.hbm %s2571_s2, 384 }
  0x59   :  { %p2221_p12 = scmp.ne.s32.totalorder %s2571_s2, %s2220_s29  ;;  %p2224_p13 = scmp.lt.u32.totalorder %s2220_s29, %s2571_s2 }
  0x5b   :  { %p2226_p0 = pnand %p2224_p13, %p2221_p12 }
  0x5d   :  { %2229 = shalt.err (!%p2226_p0)
}
  0x5e   :  { %s2230_s5 = scalar_lea.vmem %s2457_s19, 384  ;;  %p2235_p2 = scmp.lt.s32.totalorder %s2457_s19, %s2457_s19 }
  0x5f   :  { %p2231_p1 = scmp.ne.s32.totalorder %s2457_s19, %s2230_s5  ;;  %p2236_p3 = scmp.lt.s32.totalorder %s2230_s5, %s2230_s5 }
  0x61   :  { %p2237_p4 = por %p2236_p3, %p2235_p2 }
  0x63   :  { %p2238_p5 = pnand %p2237_p4, %p2231_p1 }
  0x65   :  { %2241 = shalt.err (!%p2238_p5)
}
  0x66   :  { %s2352_s0 = smov 128   ;;  %s2353_s13 = smov 8  }
  0x67   :  { %51 = dma.hbm_to_vmem [thread:$0]  %s2571_s2, 384, %s2457_s19, [#allocation6], %s2352_s0, %s2352_s0, %s2353_s13  }
  0x68   :  { %s2354_s16 = smov [#allocation10]   ;;  %s2355_s18 = smov [#allocation13]  }
  0x69   :  { %s68_s17 = sshll.u32 %s2354_s16, 4  ;;  %s90_s20 = sshll.u32 %s2355_s18, 4  ;;  %s69_s17 = int_to_ptr.vmem [resolvable:$true] %s68_s17  ;;  %s91_s20 = int_to_ptr.vmem [resolvable:$true] %s90_s20 }
  0x6a   :  { %s2242_s12 = scalar_lea.hbm %s2573_s4, 32 }
  0x6b   :  { %p2243_p6 = scmp.ne.s32.totalorder %s2573_s4, %s2242_s12  ;;  %p2246_p7 = scmp.lt.u32.totalorder %s2242_s12, %s2573_s4 }
  0x6d   :  { %p2248_p8 = pnand %p2246_p7, %p2243_p6 }
  0x6f   :  { %2251 = shalt.err (!%p2248_p8)
}
  0x70   :  { %s2252_s2 = scalar_lea.vmem %s69_s17, 32  ;;  %p2257_p10 = scmp.lt.s32.totalorder %s69_s17, %s69_s17 }
  0x71   :  { %p2253_p9 = scmp.ne.s32.totalorder %s69_s17, %s2252_s2  ;;  %p2258_p11 = scmp.lt.s32.totalorder %s2252_s2, %s2252_s2 }
  0x73   :  { %p2259_p12 = por %p2258_p11, %p2257_p10 }
  0x75   :  { %p2260_p13 = pnand %p2259_p12, %p2253_p9 }
  0x77   :  { %2263 = shalt.err (!%p2260_p13)
}
  0x78   :  { %71 = dma.hbm_to_vmem [thread:$0]  %s2573_s4, 32, %s69_s17, [#allocation9]  }
  0x79   :  { %s2264_s28 = scalar_lea.hbm %s2575_s6, 64 }
  0x7a   :  { %p2265_p0 = scmp.ne.s32.totalorder %s2575_s6, %s2264_s28  ;;  %p2268_p1 = scmp.lt.u32.totalorder %s2264_s28, %s2575_s6 }
  0x7c   :  { %p2270_p2 = pnand %p2268_p1, %p2265_p0 }
  0x7e   :  { %2273 = shalt.err (!%p2270_p2)
}
  0x7f   :  { %s2274_s11 = scalar_lea.vmem %s91_s20, 64  ;;  %p2279_p4 = scmp.lt.s32.totalorder %s91_s20, %s91_s20 }
  0x80   :  { %p2275_p3 = scmp.ne.s32.totalorder %s91_s20, %s2274_s11  ;;  %p2280_p5 = scmp.lt.s32.totalorder %s2274_s11, %s2274_s11 }
  0x82   :  { %p2281_p6 = por %p2280_p5, %p2279_p4 }
  0x84   :  { %p2282_p7 = pnand %p2281_p6, %p2275_p3 }
  0x86   :  { %2285 = shalt.err (!%p2282_p7)
}
  0x87   :  { %93 = dma.hbm_to_vmem [thread:$0]  %s2575_s6, 64, %s91_s20, [#allocation12]  }
  0x88   :  { %s2356_s0 = smov [#allocation16]   ;;  %s2286_s16 = scalar_lea.hbm %s2577_s8, 48 }
  0x89   :  { %s112_s13 = sshll.u32 %s2356_s0, 4  ;;  %p2287_p8 = scmp.ne.s32.totalorder %s2577_s8, %s2286_s16  ;;  %s113_s13 = int_to_ptr.vmem [resolvable:$true] %s112_s13 }
  0x8a   :  { %p2290_p9 = scmp.lt.u32.totalorder %s2286_s16, %s2577_s8 }
  0x8c   :  { %p2292_p10 = pnand %p2290_p9, %p2287_p8 }
  0x8e   :  { %2295 = shalt.err (!%p2292_p10)
}
  0x8f   :  { %s2296_s12 = scalar_lea.vmem %s113_s13, 48  ;;  %s2300_s6 = scalar_lea.vmem %s113_s13, 64 }
  0x90   :  { %p2297_p11 = scmp.ne.s32.totalorder %s113_s13, %s2296_s12  ;;  %p2301_p12 = scmp.lt.s32.totalorder %s113_s13, %s113_s13 }
  0x91   :  { %p2302_p13 = scmp.lt.s32.totalorder %s2300_s6, %s2296_s12 }
  0x93   :  { %p2303_p0 = por %p2302_p13, %p2301_p12 }
  0x95   :  { %p2304_p1 = pnand %p2303_p0, %p2297_p11 }
  0x97   :  { %2307 = shalt.err (!%p2304_p1)
}
  0x98   :  { %115 = dma.hbm_to_vmem [thread:$0]  %s2577_s8, 48, %s113_s13, [#allocation15]  }
  0x99   :  { %2330 = dma.done.wait [#allocation3], 128  }
  0x9a   :  { %2331 = vsyncadd [#allocation3], 4294967168 }
  0x9b   :  { %2332 = dma.done.wait [#allocation6], 512  }
  0x9c   :  { %2333 = vsyncadd [#allocation6], 4294966784 }
  0x9d   :  { %2334 = dma.done.wait [#allocation9], 160  }
  0x9e   :  { %2335 = vsyncadd [#allocation9], 4294967136 }
  0x9f   :  { %2336 = dma.done.wait [#allocation12], 8256  }
  0xa0   :  { %2337 = vsyncadd [#allocation12], 4294959040 }
  0xa1   :  { %2338 = dma.done.wait [#allocation15], 12336  }
  0xa2   :  { %2339 = vsyncadd [#allocation15], 4294954960  ;;  %v2357_v0 = vmov 0   ;;  %v151_v1 = vld [vmem:[#allocation8] sm:$0xff]  ;;  %vm161_vm0 = vcmask 1043456   ;;  %v150_v6 = vld [vmem:[#allocation7 + $0x10] sm:$0xff] }
  0xa3   :  { %200 = vmatprep.mubr.bf16.mxu1 %v2357_v0  ;;  %v146_v2 = vld [vmem:[#allocation5] sm:$0xff]  ;;  %v1643_v3 = vcombine.high %v151_v1, %v151_v1  ;;  %v1642_v4 = vcombine.low %v151_v1, %v151_v1  ;;  %v1883_v5 = vld [vmem:[#allocation7 + $0x4] ss:$8 sps:$4 sm:$0xff]   ;;  %vm157_vm1 = vcmask 64512   ;;  %v1881_v10 = vld [vmem:[#allocation7] ss:$8 sps:$4 sm:$0xff]   ;;  %v1649_v11 = vcombine.high %v150_v6, %v150_v6 }
  0xa4   :  { %v147_v8 = vpack.c.bf16 %v146_v2, %v146_v2  ;;  %v1886_v9 = vld [vmem:[#allocation11 + $0x4] ss:$16 sps:$4 sm:$0xff]   ;;  %v1648_v12 = vcombine.low %v150_v6, %v150_v6  ;;  %v1891_v13 = vld [vmem:[#allocation11] ss:$16 sps:$4 sm:$0xff]   ;;  %v1890_v19 = vld [vmem:[#allocation11 + $0xc] ss:$16 sps:$4 sm:$0xff]  }
  0xa5   :  { %1644 = vmatprep.subr.msk.bf16.mxu1 %vm161_vm0, %v1643_v3  ;;  %v163_v7 = vsel %vm161_vm0, %v1642_v4, 0  ;;  %703 = vmatprep.subr.bf16.mxu0 %v1886_v9  ;;  %v1892_v14 = vld [vmem:[#allocation11 + $0x24] ss:$16 sps:$4 sm:$0xff]   ;;  %v1897_v16 = vld [vmem:[#allocation11 + $0x20] ss:$16 sps:$4 sm:$0xff]   ;;  %vm224_vm2 = vcmask 195584  }
  0xa6   :  { %169 = vmatpush1.bf16.msra.mxu1 %v163_v7  ;;  %v144_v15 = vld [vmem:[#allocation2] sm:$0xff]  ;;  %704 = vmatpush1.bf16.msra.mxu0 %v1891_v13  ;;  %v229_v18 = vsel %vm161_vm0, %v1648_v12, 0  ;;  %v1888_v22 = vld [vmem:[#allocation11 + $0x8] ss:$16 sps:$4 sm:$0xff]   ;;  %s2358_s8 = smov [#allocation17]  }
  0xa7   :  { %234 = vmatprep.subr.bf16.mxu1 %v1883_v5  ;;  %v1898_v17 = vld [vmem:[#allocation11 + $0x44] ss:$16 sps:$4 sm:$0xff]   ;;  %705 = vmatprep.subr.bf16.mxu0 %v1892_v14  ;;  %v145_v20 = vpack.c.bf16 %v144_v15, %v144_v15  ;;  %v1903_v21 = vld [vmem:[#allocation11 + $0x40] ss:$16 sps:$4 sm:$0xff]   ;;  %v1896_v24 = vld [vmem:[#allocation11 + $0x2c] ss:$16 sps:$4 sm:$0xff]  }
  0xa8   :  { %v1904_v23 = vld [vmem:[#allocation11 + $0x64] ss:$16 sps:$4 sm:$0xff]   ;;  %v1894_v25 = vld [vmem:[#allocation11 + $0x28] ss:$16 sps:$4 sm:$0xff]   ;;  %v1909_v26 = vld [vmem:[#allocation11 + $0x60] ss:$16 sps:$4 sm:$0xff]  }
  0xa9   :  { %1645 = vmatmul.mubr.msk.bf16.vlgmr.msra.gmra.mrb[0].mxu1 %vm157_vm1, %v147_v8  ;;  %v1910_v27 = vld [vmem:[#allocation11 + $0x84] ss:$16 sps:$4 sm:$0xff]   ;;  %v1902_v28 = vld [vmem:[#allocation11 + $0x4c] ss:$16 sps:$4 sm:$0xff]   ;;  %v1915_v29 = vld [vmem:[#allocation11 + $0x80] ss:$16 sps:$4 sm:$0xff]  }
  0xaa   :  { %235 = vmatpush1.bf16.msra.mxu1 %v1881_v10  ;;  %266 = vmatprep.mubr.bf16.mxu1 %v2357_v0  ;;  %v1900_v30 = vld [vmem:[#allocation11 + $0x48] ss:$16 sps:$4 sm:$0xff]   ;;  %v1916_v31 = vld [vmem:[#allocation11 + $0xa4] ss:$16 sps:$4 sm:$0xff]   ;;  %v1908_v32 = vld [vmem:[#allocation11 + $0x6c] ss:$16 sps:$4 sm:$0xff]  }
  0xab   :  { %1650 = vmatprep.subr.msk.bf16.mxu1 %vm161_vm0, %v1649_v11  ;;  %706 = vmatpush1.bf16.msra.mxu0 %v1897_v16  ;;  %v1906_v33 = vld [vmem:[#allocation11 + $0x68] ss:$16 sps:$4 sm:$0xff]   ;;  %v1921_v34 = vld [vmem:[#allocation11 + $0xa0] ss:$16 sps:$4 sm:$0xff]   ;;  %v1922_v35 = vld [vmem:[#allocation11 + $0xc4] ss:$16 sps:$4 sm:$0xff]  }
  0xac   :  { %707 = vmatprep.subr.bf16.mxu0 %v1898_v17  ;;  %v1914_v36 = vld [vmem:[#allocation11 + $0x8c] ss:$16 sps:$4 sm:$0xff]   ;;  %v1927_v37 = vld [vmem:[#allocation11 + $0xc0] ss:$16 sps:$4 sm:$0xff]   ;;  %v1912_v38 = vld [vmem:[#allocation11 + $0x88] ss:$16 sps:$4 sm:$0xff]   ;;  %v277_v17 = vlaneseq }
  0xad   :  { %v1928_v39 = vld [vmem:[#allocation11 + $0xe4] ss:$16 sps:$4 sm:$0xff]   ;;  %v1920_v40 = vld [vmem:[#allocation11 + $0xac] ss:$16 sps:$4 sm:$0xff]   ;;  %v1918_v41 = vld [vmem:[#allocation11 + $0xa8] ss:$16 sps:$4 sm:$0xff]  }
  0xae   :  { %237 = vmatpush1.bf16.msra.mxu1 %v229_v18  ;;  %v1926_v42 = vld [vmem:[#allocation11 + $0xcc] ss:$16 sps:$4 sm:$0xff]   ;;  %v1933_v43 = vld [vmem:[#allocation11 + $0xe0] ss:$16 sps:$4 sm:$0xff]   ;;  %v1934_v44 = vld [vmem:[#allocation11 + $0x104] ss:$16 sps:$4 sm:$0xff]  }
  0xaf   :  { %744 = vmatprep.subr.bf16.mxu1 %v1890_v19  ;;  %708 = vmatpush1.bf16.msra.mxu0 %v1903_v21  ;;  %v1939_v45 = vld [vmem:[#allocation11 + $0x100] ss:$16 sps:$4 sm:$0xff]   ;;  %v1924_v46 = vld [vmem:[#allocation11 + $0xc8] ss:$16 sps:$4 sm:$0xff]   ;;  %v1940_v47 = vld [vmem:[#allocation11 + $0x124] ss:$16 sps:$4 sm:$0xff]  }
  0xb0   :  { %709 = vmatprep.subr.bf16.mxu0 %v1904_v23  ;;  %v1932_v48 = vld [vmem:[#allocation11 + $0xec] ss:$16 sps:$4 sm:$0xff]   ;;  %v1945_v49 = vld [vmem:[#allocation11 + $0x120] ss:$16 sps:$4 sm:$0xff]   ;;  %v1930_v50 = vld [vmem:[#allocation11 + $0xe8] ss:$16 sps:$4 sm:$0xff]  }
  0xb1   :  { %1651 = vmatmul.mubr.msk.bf16.vlgmr.msra.gmra.mrb[4].mxu1 %vm224_vm2, %v145_v20  ;;  %v1946_v51 = vld [vmem:[#allocation11 + $0x144] ss:$16 sps:$4 sm:$0xff]   ;;  %v1938_v52 = vld [vmem:[#allocation11 + $0x10c] ss:$16 sps:$4 sm:$0xff]   ;;  %v1951_v53 = vld [vmem:[#allocation11 + $0x140] ss:$16 sps:$4 sm:$0xff]  }
  0xb2   :  { %745 = vmatpush1.bf16.msra.mxu1 %v1888_v22  ;;  %v1936_v54 = vld [vmem:[#allocation11 + $0x108] ss:$16 sps:$4 sm:$0xff]   ;;  %v1944_v55 = vld [vmem:[#allocation11 + $0x12c] ss:$16 sps:$4 sm:$0xff]   ;;  %v1952_v59 = vld [vmem:[#allocation11 + $0x164] ss:$16 sps:$4 sm:$0xff]  }
  0xb3   :  { %746 = vmatprep.subr.bf16.mxu1 %v1896_v24  ;;  %710 = vmatpush1.bf16.msra.mxu0 %v1909_v26  ;;  %v1942_v56 = vld [vmem:[#allocation11 + $0x128] ss:$16 sps:$4 sm:$0xff]   ;;  %v1950_v57 = vld [vmem:[#allocation11 + $0x14c] ss:$16 sps:$4 sm:$0xff]   ;;  %v1957_v62 = vld [vmem:[#allocation11 + $0x160] ss:$16 sps:$4 sm:$0xff]  }
  0xb4   :  { %711 = vmatprep.subr.bf16.mxu0 %v1910_v27  ;;  %v1948_v58 = vld [vmem:[#allocation11 + $0x148] ss:$16 sps:$4 sm:$0xff]   ;;  %v1956_v60 = vld [vmem:[#allocation11 + $0x16c] ss:$16 sps:$4 sm:$0xff]   ;;  %v1958_v63 = vld [vmem:[#allocation11 + $0x184] ss:$16 sps:$4 sm:$0xff]  }
  0xb5   :  { %v1954_v61 = vld [vmem:[#allocation11 + $0x168] ss:$16 sps:$4 sm:$0xff]   ;;  %v1962_v0 = vld [vmem:[#allocation11 + $0x18c] ss:$16 sps:$4 sm:$0xff]   ;;  %v1963_v2 = vld [vmem:[#allocation11 + $0x180] ss:$16 sps:$4 sm:$0xff]  }
  0xb6   :  { %747 = vmatpush1.bf16.msra.mxu1 %v1894_v25  ;;  %v1960_v1 = vld [vmem:[#allocation11 + $0x188] ss:$16 sps:$4 sm:$0xff]   ;;  %v1964_v3 = vld [vmem:[#allocation11 + $0x1a4] ss:$16 sps:$4 sm:$0xff]   ;;  %v1968_v4 = vld [vmem:[#allocation11 + $0x1ac] ss:$16 sps:$4 sm:$0xff]  }
  0xb7   :  { %748 = vmatprep.subr.bf16.mxu1 %v1902_v28  ;;  %712 = vmatpush1.bf16.msra.mxu0 %v1915_v29  ;;  %v1966_v5 = vld [vmem:[#allocation11 + $0x1a8] ss:$16 sps:$4 sm:$0xff]   ;;  %v1969_v6 = vld [vmem:[#allocation11 + $0x1a0] ss:$16 sps:$4 sm:$0xff]   ;;  %v1970_v7 = vld [vmem:[#allocation11 + $0x1c4] ss:$16 sps:$4 sm:$0xff]  }
  0xb8   :  { %713 = vmatprep.subr.bf16.mxu0 %v1916_v31  ;;  %v1974_v8 = vld [vmem:[#allocation11 + $0x1cc] ss:$16 sps:$4 sm:$0xff]   ;;  %v1972_v9 = vld [vmem:[#allocation11 + $0x1c8] ss:$16 sps:$4 sm:$0xff]   ;;  %v1975_v10 = vld [vmem:[#allocation11 + $0x1c0] ss:$16 sps:$4 sm:$0xff]  }
  0xb9   :  { %v1976_v11 = vld [vmem:[#allocation11 + $0x1e4] ss:$16 sps:$4 sm:$0xff]   ;;  %v1978_v12 = vld [vmem:[#allocation11 + $0x1e8] ss:$16 sps:$4 sm:$0xff]   ;;  %v1980_v13 = vld [vmem:[#allocation11 + $0x1ec] ss:$16 sps:$4 sm:$0xff]  }
  0xba   :  { %749 = vmatpush1.bf16.msra.mxu1 %v1900_v30  ;;  %v1981_v14 = vld [vmem:[#allocation11 + $0x1e0] ss:$16 sps:$4 sm:$0xff]   ;;  %v1984_v15 = vld [vmem:[#allocation14 + $0x4] ss:$12 sps:$4 sm:$0xff]   ;;  %v2009_v16 = vld [vmem:[#allocation14 + $0xc8] ss:$12 sps:$4 sm:$0xff]  }
  0xbb   :  { %750 = vmatprep.subr.bf16.mxu1 %v1908_v32  ;;  %714 = vmatpush1.bf16.msra.mxu0 %v1921_v34  ;;  %v2528_v18 = vshrl.u32 %v277_v17, 7  ;;  %v275_v24 = vld [vmem:[#allocation10] sm:$0x3]  ;;  %s1629_s23 = sshll.u32 %s2358_s8, 4  ;;  %s1630_s23 = int_to_ptr.vmem [resolvable:$true] %s1629_s23 }
  0xbc   :  { %715 = vmatprep.subr.bf16.mxu0 %v1922_v35  ;;  %v2039_v17 = vld [vmem:[#allocation14 + $0x158] ss:$12 sps:$4 sm:$0xff]   ;;  %s2308_s24 = scalar_lea.vmem %s1630_s23, 384  ;;  %p2313_p3 = scmp.lt.s32.totalorder %s1630_s23, %s1630_s23 }
  0xbd   :  { %v2531_v23 = vsub.s32 0, %v2528_v18  ;;  %v2534_v25 = vsub.s32 1, %v2528_v18  ;;  %p2309_p2 = scmp.ne.s32.totalorder %s1630_s23, %s2308_s24  ;;  %p2314_p4 = scmp.lt.s32.totalorder %s2308_s24, %s2308_s24 }
  0xbe   :  { %751 = vmatpush1.bf16.msra.mxu1 %v1906_v33 }
  0xbf   :  { %752 = vmatprep.subr.bf16.mxu1 %v1914_v36  ;;  %716 = vmatpush1.bf16.msra.mxu0 %v1927_v37  ;;  %v280_v26 = vrot.slane %v275_v24, %v2531_v23  ;;  %v284_v28 = vrot.slane %v275_v24, %v2534_v25  ;;  %v2041_v24 = vld [vmem:[#allocation14 + $0x168] ss:$12 sps:$4 sm:$0xff]   ;;  %p2315_p5 = por %p2314_p4, %p2313_p3 }
  0xc0   :  { %717 = vmatprep.subr.bf16.mxu0 %v1928_v39 }
  0xc1   :  { %p2316_p6 = pnand %p2315_p5, %p2309_p2 }
  0xc2   :  { %753 = vmatpush1.bf16.msra.mxu1 %v1912_v38 }
  0xc3   :  { %754 = vmatprep.subr.bf16.mxu1 %v1920_v40  ;;  %718 = vmatpush1.bf16.msra.mxu0 %v1933_v43 }
  0xc4   :  { %719 = vmatprep.subr.bf16.mxu0 %v1934_v44  ;;  %v1987_v44 = vld [vmem:[#allocation14 + $0x1c] ss:$12 sps:$4 sm:$0xff]  }
  0xc6   :  { %755 = vmatpush1.bf16.msra.mxu1 %v1918_v41  ;;  %v1982_v41 = vld [vmem:[#allocation14] ss:$12 sps:$4 sm:$0xff]  }
  0xc7   :  { %756 = vmatprep.subr.bf16.mxu1 %v1926_v42  ;;  %720 = vmatpush1.bf16.msra.mxu0 %v1939_v45  ;;  %v2010_v42 = vld [vmem:[#allocation14 + $0x8] ss:$12 sps:$4 sm:$0xff]   ;;  %v2014_v45 = vld [vmem:[#allocation14 + $0xe0] ss:$12 sps:$4 sm:$0xff]  }
  0xc8   :  { %721 = vmatprep.subr.bf16.mxu0 %v1940_v47  ;;  %v2015_v47 = vld [vmem:[#allocation14 + $0x20] ss:$12 sps:$4 sm:$0xff]  }
  0xca   :  { %757 = vmatpush1.bf16.msra.mxu1 %v1924_v46  ;;  %v1985_v46 = vld [vmem:[#allocation14 + $0x18] ss:$12 sps:$4 sm:$0xff]  }
  0xcb   :  { %758 = vmatprep.subr.bf16.mxu1 %v1932_v48  ;;  %722 = vmatpush1.bf16.msra.mxu0 %v1945_v49  ;;  %v1990_v48 = vld [vmem:[#allocation14 + $0x34] ss:$12 sps:$4 sm:$0xff]   ;;  %v2019_v49 = vld [vmem:[#allocation14 + $0xf8] ss:$12 sps:$4 sm:$0xff]  }
  0xcc   :  { %723 = vmatprep.subr.bf16.mxu0 %v1946_v51  ;;  %v2020_v51 = vld [vmem:[#allocation14 + $0x38] ss:$12 sps:$4 sm:$0xff]  }
  0xce   :  { %759 = vmatpush1.bf16.msra.mxu1 %v1930_v50  ;;  %v1988_v50 = vld [vmem:[#allocation14 + $0x30] ss:$12 sps:$4 sm:$0xff]  }
  0xcf   :  { %760 = vmatprep.subr.bf16.mxu1 %v1938_v52  ;;  %724 = vmatpush1.bf16.msra.mxu0 %v1951_v53  ;;  %v1993_v52 = vld [vmem:[#allocation14 + $0x4c] ss:$12 sps:$4 sm:$0xff]   ;;  %v2024_v53 = vld [vmem:[#allocation14 + $0x110] ss:$12 sps:$4 sm:$0xff]  }
  0xd0   :  { %725 = vmatprep.subr.bf16.mxu0 %v1952_v59  ;;  %v2030_v59 = vld [vmem:[#allocation14 + $0x68] ss:$12 sps:$4 sm:$0xff]  }
  0xd2   :  { %761 = vmatpush1.bf16.msra.mxu1 %v1936_v54  ;;  %v1991_v54 = vld [vmem:[#allocation14 + $0x48] ss:$12 sps:$4 sm:$0xff]  }
  0xd3   :  { %762 = vmatprep.subr.bf16.mxu1 %v1944_v55  ;;  %726 = vmatpush1.bf16.msra.mxu0 %v1957_v62  ;;  %v2025_v55 = vld [vmem:[#allocation14 + $0x50] ss:$12 sps:$4 sm:$0xff]   ;;  %v1997_v62 = vld [vmem:[#allocation14 + $0x78] ss:$12 sps:$4 sm:$0xff]  }
  0xd4   :  { %727 = vmatprep.subr.bf16.mxu0 %v1958_v63  ;;  %v2035_v63 = vld [vmem:[#allocation14 + $0x80] ss:$12 sps:$4 sm:$0xff]  }
  0xd6   :  { %763 = vmatpush1.bf16.msra.mxu1 %v1942_v56  ;;  %v1996_v56 = vld [vmem:[#allocation14 + $0x64] ss:$12 sps:$4 sm:$0xff]  }
  0xd7   :  { %764 = vmatprep.subr.bf16.mxu1 %v1950_v57  ;;  %728 = vmatpush1.bf16.msra.mxu0 %v1963_v2  ;;  %v2029_v57 = vld [vmem:[#allocation14 + $0x128] ss:$12 sps:$4 sm:$0xff]   ;;  %v2005_v2 = vld [vmem:[#allocation14 + $0xac] ss:$12 sps:$4 sm:$0xff]  }
  0xd8   :  { %729 = vmatprep.subr.bf16.mxu0 %v1964_v3  ;;  %v2003_v3 = vld [vmem:[#allocation14 + $0xa8] ss:$12 sps:$4 sm:$0xff]  }
  0xda   :  { %765 = vmatpush1.bf16.msra.mxu1 %v1948_v58  ;;  %v1994_v58 = vld [vmem:[#allocation14 + $0x60] ss:$12 sps:$4 sm:$0xff]  }
  0xdb   :  { %766 = vmatprep.subr.bf16.mxu1 %v1956_v60  ;;  %730 = vmatpush1.bf16.msra.mxu0 %v1969_v6  ;;  %v1999_v60 = vld [vmem:[#allocation14 + $0x7c] ss:$12 sps:$4 sm:$0xff]  }
  0xdc   :  { %731 = vmatprep.subr.bf16.mxu0 %v1970_v7  ;;  %v2013_v6 = vld [vmem:[#allocation14 + $0xdc] ss:$12 sps:$4 sm:$0xff]   ;;  %v2011_v7 = vld [vmem:[#allocation14 + $0xd8] ss:$12 sps:$4 sm:$0xff]  }
  0xde   :  { %767 = vmatpush1.bf16.msra.mxu1 %v1954_v61  ;;  %v2034_v61 = vld [vmem:[#allocation14 + $0x140] ss:$12 sps:$4 sm:$0xff]  }
  0xdf   :  { %768 = vmatprep.subr.bf16.mxu1 %v1962_v0  ;;  %732 = vmatpush1.bf16.msra.mxu0 %v1975_v10  ;;  %v2002_v0 = vld [vmem:[#allocation14 + $0x94] ss:$12 sps:$4 sm:$0xff]   ;;  %v2023_v10 = vld [vmem:[#allocation14 + $0x10c] ss:$12 sps:$4 sm:$0xff]  }
  0xe0   :  { %733 = vmatprep.subr.bf16.mxu0 %v1976_v11  ;;  %v2021_v11 = vld [vmem:[#allocation14 + $0x108] ss:$12 sps:$4 sm:$0xff]  }
  0xe2   :  { %769 = vmatpush1.bf16.msra.mxu1 %v1960_v1  ;;  %v2000_v1 = vld [vmem:[#allocation14 + $0x90] ss:$12 sps:$4 sm:$0xff]  }
  0xe3   :  { %770 = vmatprep.subr.bf16.mxu1 %v1968_v4  ;;  %734 = vmatpush1.bf16.msra.mxu0 %v1981_v14  ;;  %v2008_v4 = vld [vmem:[#allocation14 + $0xc4] ss:$12 sps:$4 sm:$0xff]   ;;  %v2033_v14 = vld [vmem:[#allocation14 + $0x13c] ss:$12 sps:$4 sm:$0xff]  }
  0xe4   :  { %1458 = vmatprep.subr.bf16.mxu0 %v1984_v15  ;;  %v2031_v15 = vld [vmem:[#allocation14 + $0x138] ss:$12 sps:$4 sm:$0xff]  }
  0xe6   :  { %771 = vmatpush1.bf16.msra.mxu1 %v1966_v5  ;;  %v2006_v5 = vld [vmem:[#allocation14 + $0xc0] ss:$12 sps:$4 sm:$0xff]  }
  0xe7   :  { %772 = vmatprep.subr.bf16.mxu1 %v1974_v8  ;;  %v2018_v8 = vld [vmem:[#allocation14 + $0xf4] ss:$12 sps:$4 sm:$0xff]  }
  0xea   :  { %773 = vmatpush1.bf16.msra.mxu1 %v1972_v9  ;;  %v2016_v9 = vld [vmem:[#allocation14 + $0xf0] ss:$12 sps:$4 sm:$0xff]  }
  0xeb   :  { %774 = vmatprep.subr.bf16.mxu1 %v1980_v13  ;;  %v2026_v13 = vld [vmem:[#allocation14 + $0x120] ss:$12 sps:$4 sm:$0xff]  }
  0xee   :  { %775 = vmatpush1.bf16.msra.mxu1 %v1978_v12  ;;  %v2028_v12 = vld [vmem:[#allocation14 + $0x124] ss:$12 sps:$4 sm:$0xff]  }
  0xef   :  { %1812 = vmatprep.subr.bf16.mxu1 %v2009_v16  ;;  %v2038_v16 = vld [vmem:[#allocation14 + $0x154] ss:$12 sps:$4 sm:$0xff]  }
 0x17c   :  { %v202_v19 = vpop.f32.mrb[0].mxu1 }
 0x17d   :  { %v204_v20 = vpop.f32.mrb[1].mxu1 }
 0x17e   :  { %v206_v21 = vpop.f32.mrb[2].mxu1 }
 0x17f   :  { %v207_v22 = vpop.f32.mrb[3].mxu1  ;;  %v2043_v21 = vld [vmem:[#allocation14 + $0x16c] ss:$12 sps:$4 sm:$0xff]  }
 0x180   :  { %v2044_v22 = vld [vmem:[#allocation14 + $0x170] ss:$12 sps:$4 sm:$0xff]  }
 0x184   :  { %v268_v27 = vpop.f32.mrb[4].mxu1 }
 0x185   :  { %v269_v29 = vadd.f32 %v268_v27, %v202_v19  ;;  %v270_v30 = vpop.f32.mrb[5].mxu1  ;;  %v2036_v19 = vld [vmem:[#allocation14 + $0x150] ss:$12 sps:$4 sm:$0xff]  }
 0x186   :  { %v271_v31 = vadd.f32 %v270_v30, %v204_v20  ;;  %v272_v32 = vpop.f32.mrb[6].mxu1  ;;  %v2040_v20 = vld [vmem:[#allocation14 + $0x98] ss:$12 sps:$4 sm:$0xff]   ;;  %v377_v30 = vsub.s32 3, %v2528_v18 }
 0x187   :  { %v287_v33 = vadd.f32 %v280_v26, %v269_v29  ;;  %v273_v34 = vpop.f32.mrb[7].mxu1  ;;  %v2045_v26 = vld [vmem:[#allocation14 + $0xb0] ss:$12 sps:$4 sm:$0xff]  }
 0x188   :  { %v288_v35 = vadd.f32 %v284_v28, %v271_v31  ;;  %v2048_v27 = vld [vmem:[#allocation14 + $0x184] ss:$12 sps:$4 sm:$0xff]   ;;  %v2049_v28 = vld [vmem:[#allocation14 + $0x248] ss:$12 sps:$4 sm:$0xff]   ;;  %v2538_v29 = vld [vmem:[#allocation13] sm:$0xf] }
 0x189   :  { %v291_v36 = vmul.f32 0.01, %v287_v33  ;;  %vm289_vm3 = vcmp.gt.f32.partialorder %v287_v33, 0.0  ;;  %v366_v31 = vrot.slane %v2538_v29, %v2531_v23  ;;  %v370_v32 = vrot.slane %v2538_v29, %v2534_v25 }
 0x18a   :  { %vm290_vm4 = vcmp.gt.f32.partialorder %v288_v35, 0.0  ;;  %v292_v37 = vmul.f32 0.01, %v288_v35 }
 0x18b   :  { %v293_v38 = vsel %vm289_vm3, %v287_v33, %v291_v36  ;;  %v378_v33 = vrot.slane %v2538_v29, %v377_v30 }
 0x18c   :  { %v294_v39 = vsel %vm290_vm4, %v288_v35, %v292_v37  ;;  %v295_v43 = vpack.c.bf16 %v293_v38, %v293_v38 }
 0x18d   :  { %v296_v40 = vpack.c.bf16 %v294_v39, %v294_v39 }
 0x18f   :  { %735 = vmatprep.mubr.bf16.mxu0 %v296_v40  ;;  %776 = vmatprep.mubr.bf16.mxu1 %v296_v40 }
 0x190   :  { %736 = vmatmul.mubr.bf16.vlgmr.msra.gmra.mrb[0].mxu0 %v295_v43  ;;  %777 = vmatmul.mubr.bf16.vlgmr.msra.gmra.mrb[8].mxu1 %v295_v43 }
 0x191   :  { %1459 = vmatpush1.bf16.msra.mxu0 %v1982_v41  ;;  %1813 = vmatpush3.bf16.msra.mxu1 %v2010_v42 }
 0x192   :  { %1460 = vmatprep.subr.bf16.mxu0 %v1987_v44  ;;  %1814 = vmatprep.subr.bf16.mxu1 %v2014_v45 }
 0x195   :  { %1461 = vmatpush1.bf16.msra.mxu0 %v1985_v46  ;;  %1815 = vmatpush3.bf16.msra.mxu1 %v2015_v47 }
 0x196   :  { %1462 = vmatprep.subr.bf16.mxu0 %v1990_v48  ;;  %1816 = vmatprep.subr.bf16.mxu1 %v2019_v49 }
 0x199   :  { %1463 = vmatpush1.bf16.msra.mxu0 %v1988_v50  ;;  %1817 = vmatpush3.bf16.msra.mxu1 %v2020_v51  ;;  %v2046_v51 = vld [vmem:[#allocation14 + $0x180] ss:$12 sps:$4 sm:$0xff]  }
 0x19a   :  { %1464 = vmatprep.subr.bf16.mxu0 %v1993_v52  ;;  %1818 = vmatprep.subr.bf16.mxu1 %v2024_v53  ;;  %v2050_v52 = vld [vmem:[#allocation14 + $0x188] ss:$12 sps:$4 sm:$0xff]  }
 0x19d   :  { %1465 = vmatpush1.bf16.msra.mxu0 %v1991_v54  ;;  %1819 = vmatpush3.bf16.msra.mxu1 %v2025_v55  ;;  %v2053_v55 = vld [vmem:[#allocation14 + $0x19c] ss:$12 sps:$4 sm:$0xff]  }
 0x19e   :  { %1466 = vmatprep.subr.bf16.mxu0 %v1996_v56  ;;  %1820 = vmatprep.subr.bf16.mxu1 %v2029_v57  ;;  %v2054_v56 = vld [vmem:[#allocation14 + $0x260] ss:$12 sps:$4 sm:$0xff]  }
 0x1a1   :  { %1467 = vmatpush1.bf16.msra.mxu0 %v1994_v58  ;;  %1821 = vmatpush3.bf16.msra.mxu1 %v2030_v59  ;;  %v2051_v58 = vld [vmem:[#allocation14 + $0x198] ss:$12 sps:$4 sm:$0xff]   ;;  %v2055_v59 = vld [vmem:[#allocation14 + $0x1a0] ss:$12 sps:$4 sm:$0xff]  }
 0x1a2   :  { %1468 = vmatprep.subr.bf16.mxu0 %v1999_v60  ;;  %1822 = vmatprep.subr.bf16.mxu1 %v2034_v61  ;;  %v2058_v60 = vld [vmem:[#allocation14 + $0x1b4] ss:$12 sps:$4 sm:$0xff]   ;;  %v2059_v61 = vld [vmem:[#allocation14 + $0x278] ss:$12 sps:$4 sm:$0xff]  }
 0x1a5   :  { %1469 = vmatpush1.bf16.msra.mxu0 %v1997_v62  ;;  %1823 = vmatpush3.bf16.msra.mxu1 %v2035_v63  ;;  %v2056_v62 = vld [vmem:[#allocation14 + $0x1b0] ss:$12 sps:$4 sm:$0xff]   ;;  %v2060_v63 = vld [vmem:[#allocation14 + $0x1b8] ss:$12 sps:$4 sm:$0xff]  }
 0x1a6   :  { %1470 = vmatprep.subr.bf16.mxu0 %v2002_v0  ;;  %1824 = vmatprep.subr.bf16.mxu1 %v2039_v17  ;;  %v2063_v0 = vld [vmem:[#allocation14 + $0x1cc] ss:$12 sps:$4 sm:$0xff]   ;;  %v2076_v17 = vld [vmem:[#allocation14 + $0x210] ss:$12 sps:$4 sm:$0xff]  }
 0x1a9   :  { %1471 = vmatpush1.bf16.msra.mxu0 %v2000_v1  ;;  %1825 = vmatpush3.bf16.msra.mxu1 %v2040_v20  ;;  %v2064_v1 = vld [vmem:[#allocation14 + $0x290] ss:$12 sps:$4 sm:$0xff]   ;;  %v2083_v20 = vld [vmem:[#allocation14 + $0x22c] ss:$12 sps:$4 sm:$0xff]  }
 0x1aa   :  { %1472 = vmatprep.subr.bf16.mxu0 %v2005_v2  ;;  %1826 = vmatprep.subr.bf16.mxu1 %v2044_v22  ;;  %v2061_v2 = vld [vmem:[#allocation14 + $0x1c8] ss:$12 sps:$4 sm:$0xff]  }
 0x1ad   :  { %1473 = vmatpush1.bf16.msra.mxu0 %v2003_v3  ;;  %1827 = vmatpush3.bf16.msra.mxu1 %v2045_v26  ;;  %v2065_v3 = vld [vmem:[#allocation14 + $0x1d0] ss:$12 sps:$4 sm:$0xff]  }
 0x1ae   :  { %1474 = vmatprep.subr.bf16.mxu0 %v2008_v4  ;;  %1834 = vmatprep.subr.bf16.mxu1 %v2049_v28  ;;  %v2068_v4 = vld [vmem:[#allocation14 + $0x1e4] ss:$12 sps:$4 sm:$0xff]  }
 0x1af   :  { %v2085_v26 = vld [vmem:[#allocation14 + $0x230] ss:$12 sps:$4 sm:$0xff]  }
 0x1b1   :  { %1475 = vmatpush1.bf16.msra.mxu0 %v2006_v5  ;;  %v2069_v5 = vld [vmem:[#allocation14 + $0x2a8] ss:$12 sps:$4 sm:$0xff]  }
 0x1b2   :  { %1476 = vmatprep.subr.bf16.mxu0 %v2013_v6  ;;  %v373_v6 = vsub.s32 2, %v2528_v18 }
 0x1b5   :  { %1477 = vmatpush1.bf16.msra.mxu0 %v2011_v7  ;;  %v2066_v7 = vld [vmem:[#allocation14 + $0x1e0] ss:$12 sps:$4 sm:$0xff]  }
 0x1b6   :  { %1478 = vmatprep.subr.bf16.mxu0 %v2018_v8  ;;  %v2070_v8 = vld [vmem:[#allocation14 + $0x1e8] ss:$12 sps:$4 sm:$0xff]  }
 0x1b9   :  { %1479 = vmatpush1.bf16.msra.mxu0 %v2016_v9  ;;  %v2073_v9 = vld [vmem:[#allocation14 + $0x1fc] ss:$12 sps:$4 sm:$0xff]  }
 0x1ba   :  { %1480 = vmatprep.subr.bf16.mxu0 %v2023_v10  ;;  %v2074_v10 = vld [vmem:[#allocation14 + $0x2c0] ss:$12 sps:$4 sm:$0xff]  }
 0x1bd   :  { %1481 = vmatpush1.bf16.msra.mxu0 %v2021_v11  ;;  %v374_v11 = vrot.slane %v2538_v29, %v373_v6  ;;  %v2086_v29 = vld [vmem:[#allocation14 + $0x240] ss:$12 sps:$4 sm:$0xff]  }
 0x1be   :  { %1482 = vmatprep.subr.bf16.mxu0 %v2028_v12  ;;  %v2071_v12 = vld [vmem:[#allocation14 + $0x1f8] ss:$12 sps:$4 sm:$0xff]  }
 0x1c1   :  { %1483 = vmatpush1.bf16.msra.mxu0 %v2026_v13  ;;  %v2075_v13 = vld [vmem:[#allocation14 + $0x200] ss:$12 sps:$4 sm:$0xff]  }
 0x1c2   :  { %1484 = vmatprep.subr.bf16.mxu0 %v2033_v14  ;;  %v2078_v14 = vld [vmem:[#allocation14 + $0x214] ss:$12 sps:$4 sm:$0xff]  }
 0x1c5   :  { %1485 = vmatpush1.bf16.msra.mxu0 %v2031_v15  ;;  %v2079_v15 = vld [vmem:[#allocation14 + $0x2d8] ss:$12 sps:$4 sm:$0xff]  }
 0x1c6   :  { %1486 = vmatprep.subr.bf16.mxu0 %v2038_v16 }
 0x1c9   :  { %1487 = vmatpush1.bf16.msra.mxu0 %v2036_v19  ;;  %v2080_v19 = vld [vmem:[#allocation14 + $0x218] ss:$12 sps:$4 sm:$0xff]  }
 0x1ca   :  { %1488 = vmatprep.subr.bf16.mxu0 %v2043_v21  ;;  %v2084_v21 = vld [vmem:[#allocation14 + $0x2f0] ss:$12 sps:$4 sm:$0xff]  }
 0x1cd   :  { %1489 = vmatpush1.bf16.msra.mxu0 %v2041_v24  ;;  %v2081_v24 = vld [vmem:[#allocation14 + $0x228] ss:$12 sps:$4 sm:$0xff]  }
 0x1ce   :  { %1499 = vmatprep.subr.bf16.mxu0 %v2048_v27  ;;  %v2088_v27 = vld [vmem:[#allocation14 + $0x244] ss:$12 sps:$4 sm:$0xff]  }
 0x263   :  { %v737_v34 = vpop.f32.mrb[0].mxu0  ;;  %v2546_v35 = vpop.f32.mrb[8].mxu1 }
 0x264   :  { %v738_v36 = vadd.f32 %v737_v34, %v366_v31  ;;  %v739_v37 = vpop.f32.mrb[1].mxu0  ;;  %v780_v38 = vpop.f32.mrb[9].mxu1  ;;  %v779_v16 = vadd.f32 %v2546_v35, %v374_v11  ;;  %v2091_v31 = vld [vmem:[#allocation14 + $0x25c] ss:$12 sps:$4 sm:$0xff]   ;;  %v2097_v35 = vld [vmem:[#allocation14 + $0x28c] ss:$12 sps:$4 sm:$0xff]  }
 0x265   :  { %v740_v39 = vadd.f32 %v739_v37, %v370_v32  ;;  %v781_v40 = vadd.f32 %v780_v38, %v378_v33  ;;  %v741_v41 = vpop.f32.mrb[2].mxu0  ;;  %v782_v42 = vpop.f32.mrb[10].mxu1  ;;  %v2089_v32 = vld [vmem:[#allocation14 + $0x258] ss:$12 sps:$4 sm:$0xff]   ;;  %v2094_v33 = vld [vmem:[#allocation14 + $0x274] ss:$12 sps:$4 sm:$0xff]  }
 0x266   :  { %vm785_vm5 = vcmp.gt.f32.partialorder %v738_v36, 0.0  ;;  %v789_v43 = vmul.f32 0.01, %v738_v36  ;;  %v742_v47 = vpop.f32.mrb[3].mxu0  ;;  %v783_v48 = vpop.f32.mrb[11].mxu1  ;;  %vm787_vm8 = vcmp.gt.f32.partialorder %v779_v16, 0.0 }
 0x267   :  { %vm786_vm6 = vcmp.gt.f32.partialorder %v740_v39, 0.0  ;;  %v790_v44 = vmul.f32 0.01, %v740_v39  ;;  %vm788_vm7 = vcmp.gt.f32.partialorder %v781_v40, 0.0  ;;  %v792_v45 = vmul.f32 0.01, %v781_v40 }
 0x268   :  { %v793_v46 = vsel %vm785_vm5, %v738_v36, %v789_v43  ;;  %v791_v22 = vmul.f32 0.01, %v779_v16  ;;  %v2092_v34 = vld [vmem:[#allocation14 + $0x270] ss:$12 sps:$4 sm:$0xff]   ;;  %v2095_v36 = vld [vmem:[#allocation14 + $0x288] ss:$12 sps:$4 sm:$0xff]  }
 0x269   :  { %v794_v49 = vsel %vm786_vm6, %v740_v39, %v790_v44  ;;  %v796_v53 = vsel %vm788_vm7, %v781_v40, %v792_v45  ;;  %v797_v54 = vpack.c.bf16 %v793_v46, %v793_v46  ;;  %v2100_v37 = vld [vmem:[#allocation14 + $0x2a4] ss:$12 sps:$4 sm:$0xff]   ;;  %v2098_v38 = vld [vmem:[#allocation14 + $0x2a0] ss:$12 sps:$4 sm:$0xff]   ;;  %v2103_v39 = vld [vmem:[#allocation14 + $0x2bc] ss:$12 sps:$4 sm:$0xff]  }
 0x26a   :  { %v798_v50 = vpack.c.bf16 %v794_v49, %v794_v49  ;;  %v800_v57 = vpack.c.bf16 %v796_v53, %v796_v53  ;;  %v795_v28 = vsel %vm787_vm8, %v779_v16, %v791_v22  ;;  %v2101_v40 = vld [vmem:[#allocation14 + $0x2b8] ss:$12 sps:$4 sm:$0xff]   ;;  %v2106_v41 = vld [vmem:[#allocation14 + $0x2d4] ss:$12 sps:$4 sm:$0xff]   ;;  %v2104_v42 = vld [vmem:[#allocation14 + $0x2d0] ss:$12 sps:$4 sm:$0xff]  }
 0x26b   :  { %v799_v30 = vpack.c.bf16 %v795_v28, %v795_v28  ;;  %v2109_v43 = vld [vmem:[#allocation14 + $0x2ec] ss:$12 sps:$4 sm:$0xff]   ;;  %v2107_v44 = vld [vmem:[#allocation14 + $0x2e8] ss:$12 sps:$4 sm:$0xff]  }
 0x26c   :  { %1490 = vmatprep.mubr.bf16.mxu0 %v798_v50  ;;  %1572 = vmatprep.mubr.bf16.mxu1 %v798_v50  ;;  %v929_v50 = vld [vmem:[#allocation16] sm:$0x7] }
 0x26d   :  { %1491 = vmatmul.mubr.bf16.vlgmr.msra.gmra.mrb[4].mxu0 %v797_v54  ;;  %1573 = vmatmul.mubr.bf16.vlgmr.msra.gmra.mrb[12].mxu1 %v797_v54 }
 0x26e   :  { %1500 = vmatpush1.bf16.msra.mxu0 %v2046_v51  ;;  %1835 = vmatpush3.bf16.msra.mxu1 %v2050_v52  ;;  %v942_v51 = vrot.slane %v929_v50, %v373_v6 }
 0x26f   :  { %1531 = vmatprep.mubr.bf16.mxu0 %v800_v57  ;;  %1612 = vmatprep.mubr.bf16.mxu1 %v800_v57 }
 0x270   :  { %1501 = vmatprep.subr.bf16.mxu0 %v2053_v55  ;;  %1836 = vmatprep.subr.bf16.mxu1 %v2054_v56 }
 0x272   :  { %1502 = vmatpush1.bf16.msra.mxu0 %v2051_v58  ;;  %1837 = vmatpush3.bf16.msra.mxu1 %v2055_v59  ;;  %v934_v59 = vrot.slane %v929_v50, %v2531_v23 }
 0x273   :  { %1503 = vmatprep.subr.bf16.mxu0 %v2058_v60  ;;  %1838 = vmatprep.subr.bf16.mxu1 %v2059_v61  ;;  %v938_v60 = vrot.slane %v929_v50, %v2534_v25 }
 0x276   :  { %1504 = vmatpush1.bf16.msra.mxu0 %v2056_v62  ;;  %1839 = vmatpush3.bf16.msra.mxu1 %v2060_v63 }
 0x277   :  { %1505 = vmatprep.subr.bf16.mxu0 %v2063_v0  ;;  %1840 = vmatprep.subr.bf16.mxu1 %v2064_v1 }
 0x27a   :  { %1506 = vmatpush1.bf16.msra.mxu0 %v2061_v2  ;;  %1841 = vmatpush3.bf16.msra.mxu1 %v2065_v3 }
 0x27b   :  { %1507 = vmatprep.subr.bf16.mxu0 %v2068_v4  ;;  %1842 = vmatprep.subr.bf16.mxu1 %v2069_v5 }
 0x27e   :  { %1508 = vmatpush1.bf16.msra.mxu0 %v2066_v7  ;;  %1843 = vmatpush3.bf16.msra.mxu1 %v2070_v8 }
 0x27f   :  { %1509 = vmatprep.subr.bf16.mxu0 %v2073_v9  ;;  %1844 = vmatprep.subr.bf16.mxu1 %v2074_v10 }
 0x282   :  { %1510 = vmatpush1.bf16.msra.mxu0 %v2071_v12  ;;  %1845 = vmatpush3.bf16.msra.mxu1 %v2075_v13 }
 0x283   :  { %1511 = vmatprep.subr.bf16.mxu0 %v2078_v14  ;;  %1846 = vmatprep.subr.bf16.mxu1 %v2079_v15 }
 0x286   :  { %1512 = vmatpush1.bf16.msra.mxu0 %v2076_v17  ;;  %1847 = vmatpush3.bf16.msra.mxu1 %v2080_v19 }
 0x287   :  { %1513 = vmatprep.subr.bf16.mxu0 %v2083_v20  ;;  %1848 = vmatprep.subr.bf16.mxu1 %v2084_v21 }
 0x28a   :  { %1514 = vmatpush1.bf16.msra.mxu0 %v2081_v24  ;;  %1849 = vmatpush3.bf16.msra.mxu1 %v2085_v26 }
 0x28b   :  { %1515 = vmatprep.subr.bf16.mxu0 %v2088_v27 }
 0x28d   :  { %1613 = vmatmul.mubr.bf16.vlgmr.msra.gmra.mrb[16].mxu1 %v799_v30 }
 0x28e   :  { %1516 = vmatpush1.bf16.msra.mxu0 %v2086_v29 }
 0x28f   :  { %1517 = vmatprep.subr.bf16.mxu0 %v2091_v31 }
 0x292   :  { %1518 = vmatpush1.bf16.msra.mxu0 %v2089_v32 }
 0x293   :  { %1519 = vmatprep.subr.bf16.mxu0 %v2094_v33 }
 0x296   :  { %1520 = vmatpush1.bf16.msra.mxu0 %v2092_v34 }
 0x297   :  { %1521 = vmatprep.subr.bf16.mxu0 %v2097_v35 }
 0x29a   :  { %1522 = vmatpush1.bf16.msra.mxu0 %v2095_v36 }
 0x29b   :  { %1523 = vmatprep.subr.bf16.mxu0 %v2100_v37 }
 0x29e   :  { %1524 = vmatpush1.bf16.msra.mxu0 %v2098_v38 }
 0x29f   :  { %1525 = vmatprep.subr.bf16.mxu0 %v2103_v39 }
 0x2a2   :  { %1526 = vmatpush1.bf16.msra.mxu0 %v2101_v40 }
 0x2a3   :  { %1527 = vmatprep.subr.bf16.mxu0 %v2106_v41 }
 0x2a6   :  { %1528 = vmatpush1.bf16.msra.mxu0 %v2104_v42 }
 0x2a7   :  { %1529 = vmatprep.subr.bf16.mxu0 %v2109_v43 }
 0x2aa   :  { %1530 = vmatpush1.bf16.msra.mxu0 %v2107_v44 }
 0x2ad   :  { %1532 = vmatmul.mubr.bf16.vlgmr.msra.gmra.mrb[4].mxu0 %v799_v30 }
 0x340   :  { %v1828_v45 = vpop.f32.mrb[12].mxu1 }
 0x341   :  { %v1829_v46 = vpop.f32.mrb[13].mxu1 }
 0x342   :  { %v1830_v47 = vadd.f32 %v1829_v46, %v1828_v45  ;;  %v1831_v48 = vpop.f32.mrb[14].mxu1 }
 0x343   :  { %v1832_v49 = vpop.f32.mrb[15].mxu1 }
 0x344   :  { %v1575_v54 = vadd.f32 %v1830_v47, %v942_v51 }
 0x360   :  { %v1850_v52 = vpop.f32.mrb[16].mxu1 }
 0x361   :  { %v1851_v53 = vpop.f32.mrb[17].mxu1 }
 0x362   :  { %v1852_v55 = vadd.f32 %v1851_v53, %v1850_v52  ;;  %v1853_v56 = vpop.f32.mrb[18].mxu1 }
 0x363   :  { %v1854_v57 = vpop.f32.mrb[19].mxu1 }
 0x364   :  { %v1615_v58 = vadd.f32 %v1852_v55, %v1575_v54 }
 0x366   :  { %1622 = vst [vmem:[#allocation17 + $0x10] sm:$0xff] %v1615_v58 }
 0x380   :  { %v1533_v61 = vpop.f32.mrb[4].mxu0 }
 0x381   :  { %v1856_v62 = vadd.f32 %v1533_v61, %v934_v59  ;;  %v1535_v63 = vpop.f32.mrb[5].mxu0 }
 0x382   :  { %v1857_v0 = vadd.f32 %v1535_v63, %v938_v60  ;;  %v1537_v18 = vpop.f32.mrb[6].mxu0 }
 0x383   :  { %1620 = vst [vmem:[#allocation17] sm:$0xff] %v1856_v62  ;;  %v1538_v1 = vpop.f32.mrb[7].mxu0 }
 0x384   :  { %1621 = vst [vmem:[#allocation17 + $0x8] sm:$0xff] %v1857_v0 }
 0x385   :  { %2319 = shalt.err (!%p2316_p6)
}
 0x386   :  { %s2320_s19 = scalar_lea.hbm %s2578_s9, 384 }
 0x387   :  { %p2321_p7 = scmp.ne.s32.totalorder %s2578_s9, %s2320_s19  ;;  %p2324_p8 = scmp.lt.u32.totalorder %s2320_s19, %s2578_s9 }
 0x389   :  { %p2326_p9 = pnand %p2324_p8, %p2321_p7 }
 0x38b   :  { %2329 = shalt.err (!%p2326_p9)
}
 0x38c   :  { %1632 = dma.vmem_to_hbm [thread:$0]  %s1630_s23, 384, %s2578_s9, [#allocation4]  }
 0x38d   :  { %2340 = dma.done.wait [#allocation4], 384  }
 0x38e   :  { %2341 = vsyncadd [#allocation4], 4294966912 }
 0x38f   :  { %1636 = vsyncpa [#allocation3], 1 }
 0x390   :  { %1637 = vsyncpa [#allocation6], 1 }
 0x391   :  { %1638 = vsyncpa [#allocation9], 1 }
 0x392   :  { %1639 = vsyncpa [#allocation12], 1 }
 0x393   :  { %1640 = vsyncpa [#allocation15], 1 }
 0x394   :  { %1641 = vsyncpa [#allocation4], 1 }

</bundles_post_ra>
